<compile_context>
chip_gen: v7x
topology: tpu7x:2x2x1
jax: 0.10.0
libtpu: 0.0.40
codegen_flags: <defaults>
</compile_context>

<pallas_src>
import math

import jax
import jax.numpy as jnp
from jax.experimental import pallas as pl
from jax.experimental.pallas import tpu as pltpu


def _round_up(x, m):
    return ((x + m - 1) // m) * m


def _vmem_capacity_bytes():
    """Physical VMEM per TensorCore; falls back to the v7x-safe 64 MiB."""
    try:
        return int(pltpu.get_tpu_info().vmem_capacity_bytes)
    except Exception:
        return 64 * 1024 * 1024


def _divisor_tile(H, desired):
    """Largest lane-aligned divisor of H that is <= desired (else full H)."""
    if H <= desired:
        return H
    for th in (desired, 2048, 1024, 512, 256, 128):
        if th <= desired and H % th == 0:
            return th
    return H


def _weight_spec(block_shape, index_map, single_buffered):
    """BlockSpec for a weight; single-buffer it when its block index is constant."""
    if single_buffered:
        try:
            return pl.BlockSpec(block_shape, index_map,
                                pipeline_mode=pl.Buffered(1))
        except Exception:  # older JAX without pipeline_mode support
            pass
    return pl.BlockSpec(block_shape, index_map)


def _mlp_kernel(x_ref, w1_ref, b1_ref, w2_ref, b2_ref, o_ref, acc_ref):
    # x_ref : (tm, D)  token-row tile
    # w1_ref: (D, th)  fc1 weight tile       b1_ref: (1, H) full bias (constant)
    # w2_ref: (th, D)  fc2 weight tile       b2_ref: (1, D) full bias (constant)
    # o_ref : (tm, D)  output tile           acc_ref: (tm, D) f32 accumulator
    h_idx = pl.program_id(1)
    th = w1_ref.shape[1]

    @pl.when(h_idx == 0)
    def _init():
        # fc2 bias is folded into the accumulator exactly once.
        acc_ref[...] = jnp.broadcast_to(
            b2_ref[...].astype(jnp.float32), acc_ref.shape)

    # fc1 on this hidden slice (MXU, native operand dtype, f32 accumulation).
    h = jnp.dot(x_ref[...], w1_ref[...], preferred_element_type=jnp.float32)

    # b1 stays fully resident; slice the current hidden chunk in-kernel.
    if th == b1_ref.shape[1]:
        b1_slice = b1_ref[...]
    else:
        start = pl.multiple_of(h_idx * th, th)
        b1_slice = b1_ref[:, pl.ds(start, th)]
    h = h + b1_slice.astype(jnp.float32)

    # Exact erf GELU (torch.nn.GELU() default), computed in f32.
    h = 0.5 * h * (1.0 + jax.lax.erf(h * (1.0 / math.sqrt(2.0))))

    # Partial fc2 contribution from this hidden slice; accumulate in f32.
    acc_ref[...] += jnp.dot(h.astype(w2_ref.dtype), w2_ref[...],
                            preferred_element_type=jnp.float32)

    @pl.when(h_idx == pl.num_programs(1) - 1)
    def _finalize():
        o_ref[...] = acc_ref[...].astype(o_ref.dtype)


def mlp_block(x, w1, b1, w2, b2, *, tile_m=512, tile_h=1024,
              compute_dtype=jnp.bfloat16):
    """ViT MLP block forward: GELU(x @ w1 + b1) @ w2 + b2.

    x: (B, N, D). w1: (D, H), b1: (H,), w2: (H, D), b2: (D,).
    compute_dtype: dtype fed to the MXU for x/w1/w2 (default bf16 = native MXU
    path on v5e/v6e/v7x). Accumulation and GELU are always f32 and the output
    keeps x's original dtype. Pass jnp.float32 / None for a full-f32 path.
    """
    B, N, D = x.shape
    H = w1.shape[1]
    M = B * N
    out_dtype = x.dtype

    if compute_dtype is not None:
        x = x.astype(compute_dtype)
        w1 = w1.astype(compute_dtype)
        w2 = w2.astype(compute_dtype)

    x_item = jnp.dtype(x.dtype).itemsize
    w_item = jnp.dtype(w1.dtype).itemsize
    out_item = jnp.dtype(out_dtype).itemsize

    # Sublane granularity of the packed compute dtype (8 f32 / 16 bf16 / 32 i8).
    sub = max(8, 32 // x_item)

    # Row tile: large by default; shrink (sublane-aligned) for small token
    # counts, and keep >= 2 row tiles when possible so the "parallel" axis can
    # split across v7x's two TensorCores.
    tm = max(sub, min(_round_up(tile_m, sub), _round_up(M, sub)))
    if pl.cdiv(M, tm) < 2 and M >= 2 * sub:
        tm = _round_up(pl.cdiv(M, 2), sub)

    cap = _vmem_capacity_bytes()
    budget = int(cap * 0.8)

    def footprint(tm_, th_, wf_):
        # Per-step VMEM bytes: double-buffered activations/outputs, weights with
        # buffer factor wf_, biases, f32 accumulator + f32 GELU intermediate.
        return (2 * tm_ * D * x_item
                + 2 * tm_ * D * out_item
                + wf_ * D * th_ * w_item
                + wf_ * th_ * D * w_item
                + 2 * H * b1.dtype.itemsize
                + 2 * D * b2.dtype.itemsize
                + tm_ * D * 4
                + 2 * tm_ * th_ * 4)

    # Prefer full-H weight residency: weight index_maps become constant, so each
    # weight matrix crosses HBM exactly once for the whole kernel.
    single_buf_w = 2 * D * H * w_item >= (2 << 20)   # only bother when sizeable
    if footprint(tm, H, 1 if single_buf_w else 2) <= budget:
        th = H
    else:
        single_buf_w = False
        th = _divisor_tile(H, tile_h)
        while footprint(tm, th, 2) > budget and tm > sub:
            tm = max(sub, _round_up(tm // 2, sub))

    weights_resident = (th == H)
    single_buf_w = single_buf_w and weights_resident
    grid = (pl.cdiv(M, tm), H // th)

    x2d = x.reshape(M, D)          # no jnp.pad: Pallas handles the ragged edge
    b1_2d = b1.reshape(1, H)
    b2_2d = b2.reshape(1, D)

    if weights_resident:
        w1_map = lambda i, h: (0, 0)
        w2_map = lambda i, h: (0, 0)
    else:
        w1_map = lambda i, h: (0, h)
        w2_map = lambda i, h: (h, 0)

    vmem_limit = int(min(cap, max(footprint(tm, th, 2) * 5 // 4,
                                  32 * 1024 * 1024)))

    cost = pl.CostEstimate(
        flops=4 * M * D * H,
        transcendentals=M * H,
        bytes_accessed=(x2d.size * x_item
                        + w1.size * w_item + w2.size * w_item
                        + b1.size * b1.dtype.itemsize
                        + b2.size * b2.dtype.itemsize
                        + M * D * out_item),
    )

    out2d = pl.pallas_call(
        _mlp_kernel,
        out_shape=jax.ShapeDtypeStruct((M, D), out_dtype),
        grid_spec=pltpu.PrefetchScalarGridSpec(
            num_scalar_prefetch=0,
            grid=grid,
            in_specs=[
                pl.BlockSpec((tm, D), lambda i, h: (i, 0)),     # x row tile
                _weight_spec((D, th), w1_map, single_buf_w),    # w1 tile
                pl.BlockSpec((1, H), lambda i, h: (0, 0)),      # b1 (full)
                _weight_spec((th, D), w2_map, single_buf_w),    # w2 tile
                pl.BlockSpec((1, D), lambda i, h: (0, 0)),      # b2 (full)
            ],
            out_specs=pl.BlockSpec((tm, D), lambda i, h: (i, 0)),
            scratch_shapes=[pltpu.VMEM((tm, D), jnp.float32)],
        ),
        compiler_params=pltpu.CompilerParams(
            dimension_semantics=("parallel", "arbitrary"),
            vmem_limit_bytes=vmem_limit,
        ),
        cost_estimate=cost,
    )(x2d, w1, b1_2d, w2, b2_2d)

    return out2d.reshape(B, N, D)


def _reference_mlp(x, w1, b1, w2, b2):
    h = jnp.einsum("bnd,dh->bnh", x, w1) + b1
    h = jax.nn.gelu(h, approximate=False)
    return jnp.einsum("bnh,hd->bnd", h, w2) + b2


if __name__ == "__main__":
    # Small shapes consistent with the forward: (B, N, D), hidden H.
    B, N, D, H = 2, 8, 32, 64

    key = jax.random.PRNGKey(0)
    kx, kw1, kb1, kw2, kb2 = jax.random.split(key, 5)

    x = jax.random.normal(kx, (B, N, D), dtype=jnp.float32)

    # Deterministic parameter init (torch-Linear-style uniform bound
    # 1/sqrt(fan_in)); stored as (in, out) so the kernel computes x @ W.
    bound1 = 1.0 / math.sqrt(D)
    w1 = jax.random.uniform(kw1, (D, H), jnp.float32, -bound1, bound1)
    b1 = jax.random.uniform(kb1, (H,), jnp.float32, -bound1, bound1)
    bound2 = 1.0 / math.sqrt(H)
    w2 = jax.random.uniform(kw2, (H, D), jnp.float32, -bound2, bound2)
    b2 = jax.random.uniform(kb2, (D,), jnp.float32, -bound2, bound2)

    ref = _reference_mlp(x, w1, b1, w2, b2)

    # f32 MXU path: tight parity with the f32 reference.
    out_f32 = jax.block_until_ready(
        mlp_block(x, w1, b1, w2, b2, compute_dtype=jnp.float32))
    assert out_f32.shape == (B, N, D)
    assert out_f32.dtype == x.dtype
    assert jnp.allclose(out_f32, ref, atol=5e-3, rtol=5e-3), "f32 path mismatch"

    # Default bf16-operand MXU path (f32 accumulation): looser tolerance.
    out_bf16 = jax.block_until_ready(mlp_block(x, w1, b1, w2, b2))
    assert out_bf16.shape == (B, N, D)
    assert out_bf16.dtype == x.dtype
    assert jnp.allclose(out_bf16, ref, atol=5e-2, rtol=5e-2), "bf16 path mismatch"

    print("KERNEL_OK")
</pallas_src>

<mosaic_0001>
module attributes {stable_mosaic.version = 11 : i64} {
  func.func @_mlp_kernel(%arg0: i32, %arg1: i32, %arg2: memref<8x32xf32, #tpu.memory_space<vmem>>, %arg3: memref<32x64xf32, #tpu.memory_space<vmem>>, %arg4: memref<1x64xf32, #tpu.memory_space<vmem>>, %arg5: memref<64x32xf32, #tpu.memory_space<vmem>>, %arg6: memref<1x32xf32, #tpu.memory_space<vmem>>, %arg7: memref<8x32xf32, #tpu.memory_space<vmem>>, %arg8: memref<8x32xf32, #tpu.memory_space<vmem>>) attributes {dimension_semantics = [#tpu.dimension_semantics<parallel>, #tpu.dimension_semantics<arbitrary>], iteration_bounds = array<i64: 2, 1>, scalar_prefetch = 0 : i64, scratch_operands = 1 : i64, tpu.core_type = #tpu.core_type<tc>, window_params = [{transform_indices = @transform_0, window_bounds = array<i64: 8, 32>}, {pipeline_mode = #tpu.pipeline_mode<synchronous>, transform_indices = @transform_1, window_bounds = array<i64: 32, 64>}, {pipeline_mode = #tpu.pipeline_mode<synchronous>, transform_indices = @transform_2, window_bounds = array<i64: 1, 64>}, {pipeline_mode = #tpu.pipeline_mode<synchronous>, transform_indices = @transform_3, window_bounds = array<i64: 64, 32>}, {pipeline_mode = #tpu.pipeline_mode<synchronous>, transform_indices = @transform_4, window_bounds = array<i64: 1, 32>}, {transform_indices = @transform_5, window_bounds = array<i64: 8, 32>}]} {
    %c0_i32 = arith.constant 0 : i32
    %0 = arith.cmpi eq, %arg1, %c0_i32 : i32
    %1 = arith.extui %0 : i1 to i32
    %c0_i32_0 = arith.constant 0 : i32
    %2 = arith.cmpi ne, %1, %c0_i32_0 : i32
    scf.if %2 {
      %c0_18 = arith.constant 0 : index
      %c0_19 = arith.constant 0 : index
      %25 = vector.load %arg6[%c0_18, %c0_19] : memref<1x32xf32, #tpu.memory_space<vmem>>, vector<1x32xf32>
      %26 = vector.shape_cast %25 : vector<1x32xf32> to vector<1x32xf32>
      %27 = vector.broadcast %26 : vector<1x32xf32> to vector<8x32xf32>
      %c0_20 = arith.constant 0 : index
      %c0_21 = arith.constant 0 : index
      %28 = vector.load %arg8[%c0_20, %c0_21] : memref<8x32xf32, #tpu.memory_space<vmem>>, vector<8x32xf32>
      tpu.vector_store %arg8[%c0_20, %c0_21], %27 {strides = array<i32>} : memref<8x32xf32, #tpu.memory_space<vmem>>, vector<8x32xf32>,
    } else {
    }
    %c0 = arith.constant 0 : index
    %c0_1 = arith.constant 0 : index
    %3 = vector.load %arg2[%c0, %c0_1] : memref<8x32xf32, #tpu.memory_space<vmem>>, vector<8x32xf32>
    %c0_2 = arith.constant 0 : index
    %c0_3 = arith.constant 0 : index
    %4 = vector.load %arg3[%c0_2, %c0_3] : memref<32x64xf32, #tpu.memory_space<vmem>>, vector<32x64xf32>
    %cst = arith.constant dense<0.000000e+00> : vector<8x64xf32>
    %5 = tpu.matmul %3, %4, %cst {dimension_numbers = #tpu.dot_dimension_numbers<[1], [0], [0], [1], [0, 0, 1, 1], [], []>} : vector<8x32xf32>, vector<32x64xf32>, vector<8x64xf32> -> vector<8x64xf32>
    %c0_4 = arith.constant 0 : index
    %c0_5 = arith.constant 0 : index
    %6 = vector.load %arg4[%c0_4, %c0_5] : memref<1x64xf32, #tpu.memory_space<vmem>>, vector<1x64xf32>
    %7 = vector.broadcast %6 : vector<1x64xf32> to vector<8x64xf32>
    %8 = arith.addf %5, %7 : vector<8x64xf32>
    %cst_6 = arith.constant 5.000000e-01 : f32
    %9 = vector.broadcast %cst_6 : f32 to vector<8x64xf32>
    %10 = arith.mulf %9, %8 : vector<8x64xf32>
    %cst_7 = arith.constant 0.707106769 : f32
    %11 = vector.broadcast %cst_7 : f32 to vector<8x64xf32>
    %12 = arith.mulf %8, %11 : vector<8x64xf32>
    %13 = math.erf %12 : vector<8x64xf32>
    %cst_8 = arith.constant 1.000000e+00 : f32
    %14 = vector.broadcast %cst_8 : f32 to vector<8x64xf32>
    %15 = arith.addf %14, %13 : vector<8x64xf32>
    %16 = arith.mulf %10, %15 : vector<8x64xf32>
    %c0_9 = arith.constant 0 : index
    %c0_10 = arith.constant 0 : index
    %17 = vector.load %arg8[%c0_9, %c0_10] : memref<8x32xf32, #tpu.memory_space<vmem>>, vector<8x32xf32>
    %c0_11 = arith.constant 0 : index
    %c0_12 = arith.constant 0 : index
    %18 = vector.load %arg5[%c0_11, %c0_12] : memref<64x32xf32, #tpu.memory_space<vmem>>, vector<64x32xf32>
    %cst_13 = arith.constant dense<0.000000e+00> : vector<8x32xf32>
    %19 = tpu.matmul %16, %18, %cst_13 {dimension_numbers = #tpu.dot_dimension_numbers<[1], [0], [0], [1], [0, 0, 1, 1], [], []>} : vector<8x64xf32>, vector<64x32xf32>, vector<8x32xf32> -> vector<8x32xf32>
    %20 = arith.addf %17, %19 : vector<8x32xf32>
    %c0_14 = arith.constant 0 : index
    %c0_15 = arith.constant 0 : index
    %21 = vector.load %arg8[%c0_14, %c0_15] : memref<8x32xf32, #tpu.memory_space<vmem>>, vector<8x32xf32>
    tpu.vector_store %arg8[%c0_14, %c0_15], %20 {strides = array<i32>} : memref<8x32xf32, #tpu.memory_space<vmem>>, vector<8x32xf32>,
    %c0_i32_16 = arith.constant 0 : i32
    %22 = arith.cmpi eq, %arg1, %c0_i32_16 : i32
    %23 = arith.extui %22 : i1 to i32
    %c0_i32_17 = arith.constant 0 : i32
    %24 = arith.cmpi ne, %23, %c0_i32_17 : i32
    scf.if %24 {
      %c0_18 = arith.constant 0 : index
      %c0_19 = arith.constant 0 : index
      %25 = vector.load %arg8[%c0_18, %c0_19] : memref<8x32xf32, #tpu.memory_space<vmem>>, vector<8x32xf32>
      %c0_20 = arith.constant 0 : index
      %c0_21 = arith.constant 0 : index
      %26 = vector.load %arg7[%c0_20, %c0_21] : memref<8x32xf32, #tpu.memory_space<vmem>>, vector<8x32xf32>
      tpu.vector_store %arg7[%c0_20, %c0_21], %25 {strides = array<i32>} : memref<8x32xf32, #tpu.memory_space<vmem>>, vector<8x32xf32>,
    } else {
    }
    return
  }
  func.func @transform_0(%arg0: i32, %arg1: i32) -> (i32, i32) {
    %c0_i32 = arith.constant 0 : i32
    %c0_i32_0 = arith.constant 0 : i32
    return %arg0, %c0_i32 : i32, i32
  }
  func.func @transform_1(%arg0: i32, %arg1: i32) -> (i32, i32) {
    %c0_i32 = arith.constant 0 : i32
    %c0_i32_0 = arith.constant 0 : i32
    %c0_i32_1 = arith.constant 0 : i32
    return %c0_i32, %c0_i32_0 : i32, i32
  }
  func.func @transform_2(%arg0: i32, %arg1: i32) -> (i32, i32) {
    %c0_i32 = arith.constant 0 : i32
    %c0_i32_0 = arith.constant 0 : i32
    %c0_i32_1 = arith.constant 0 : i32
    return %c0_i32, %c0_i32_0 : i32, i32
  }
  func.func @transform_3(%arg0: i32, %arg1: i32) -> (i32, i32) {
    %c0_i32 = arith.constant 0 : i32
    %c0_i32_0 = arith.constant 0 : i32
    %c0_i32_1 = arith.constant 0 : i32
    return %c0_i32, %c0_i32_0 : i32, i32
  }
  func.func @transform_4(%arg0: i32, %arg1: i32) -> (i32, i32) {
    %c0_i32 = arith.constant 0 : i32
    %c0_i32_0 = arith.constant 0 : i32
    %c0_i32_1 = arith.constant 0 : i32
    return %c0_i32, %c0_i32_0 : i32, i32
  }
  func.func @transform_5(%arg0: i32, %arg1: i32) -> (i32, i32) {
    %c0_i32 = arith.constant 0 : i32
    %c0_i32_0 = arith.constant 0 : i32
    return %arg0, %c0_i32 : i32, i32
  }
}

</mosaic_0001>

<bundles_post_ra>
// kernel: tpu_custom_call.1
= control target key start
LH: loop header
LB: loop body
LE: loop exit
PB: predicated region body
PF: predicated region fallthrough
CT: control target
= control target key end

     0   :  { %10 = vsyncpa [#allocation4], 0  ;;  %s916_s0 = inlined_call_operand.vmem [shape: f32[16,32], index: 0, kind: input, shape index: {}]   ;;  %s917_s1 = inlined_call_operand.vmem [shape: f32[32,64], index: 1, kind: input, shape index: {}]   ;;  %s918_s2 = inlined_call_operand.vmem [shape: f32[1,64], index: 2, kind: input, shape index: {}]   ;;  %s919_s3 = inlined_call_operand.vmem [shape: f32[64,32], index: 3, kind: input, shape index: {}]   ;;  %s920_s4 = inlined_call_operand.vmem [shape: f32[1,32], index: 4, kind: input, shape index: {}]   ;;  %s921_s5 = inlined_call_operand.hbm [shape: f32[16,32], index: 5, kind: output, shape index: {}]  }
   0x1   :  { %12 = vsyncpa [#allocation4 + $0x1], 0  ;;  %s758_s18 = smov 0   ;;  %s760_s19 = smov 0  }
   0x2   :  { %s762_s20 = smov 0   ;;  %s764_s21 = smov 0  }
   0x3   :  { %s766_s22 = smov 0   ;;  %s768_s23 = smov 0  }
   0x4 LB: > { %s507_s24 = sadd.s32 4294967295, %s722_s23   ;;  %s508_s25 = sadd.s32 4294967294, %s722_s23   ;;  %s722_s23 = sphi %s768_s23, %s18_s23   ;;  %s718_s22 = sphi %s766_s22, %s928_s22   ;;  %s714_s21 = sphi %s764_s21, %s927_s21   ;;  %s710_s20 = sphi %s762_s20, %s926_s20   ;;  %s706_s19 = sphi %s760_s19, %s925_s19   ;;  %s702_s18 = sphi %s758_s18, %s924_s18  }
   0x5   : > { %s30_s26 = sadd.s32 1, %s718_s22  ;;  %s147_s27 = sadd.s32 1, %s710_s20 }
   0x6   : > { %p32_p0 = scmp.ge.s32.totalorder %s30_s26, 2  ;;  %p157_p1 = scmp.ne.s32.totalorder %s710_s20, %s706_s19 }
   0x7   : > { %p158_p2 = scmp.eq.s32.totalorder %s507_s24, 1  ;;  %p163_p3 = scmp.ne.s32.totalorder %s706_s19, %s702_s18 }
   0x8   : > { %s930_s26 = smov (%p32_p0, %s30_s26), 0  ;;  %p164_p5 = scmp.eq.s32.totalorder %s508_s25, 1 }
   0x9   : > { %p798_p4 = por %p158_p2, %p157_p1  ;;  %s144_s29 = ssub.s32 %s718_s22, %s930_s26 }
   0xa   : > { %p511_p6 = scmp.ge.s32.totalorder %s722_s23, 1  ;;  %p145_p7 = scmp.eq.s32.totalorder %s144_s29, 0 }
   0xb   : > { %p805_p8 = por %p164_p5, %p163_p3  ;;  %p201_p9 = scmp.lt.s32.totalorder %s722_s23, 3 }
   0xc   : > { %s811_s6 = scalar_select %p145_p7, %s710_s20, %s147_s27  }
   0xd   : > { %p202_p10 = pnand %p511_p6, %p201_p9 }
   0xe   : > { %v246_v0 = vld [vmem:[%s917_s1] sm:$0xff] (!%p202_p10)  ;;  %v247_v1 = vld [vmem:[%s917_s1 + $0x8] sm:$0xff] (!%p202_p10)  ;;  %v248_v2 = vld [vmem:[%s917_s1 + $0x10] sm:$0xff] (!%p202_p10)  ;;  %v724_v3 = vmov (!%p202_p10), 0.0|0.0   ;;  %vm725_vm0 = vmmov (!%p202_p10), 0   ;;  %v726_v6 = vmov (!%p202_p10), 0.0  }
   0xf   : > { %205 = sbr.rel (%p202_p10) target bundleno = 494 (0x1ee), region = 40  ;;  %566 = vmatprep.subr.bf16.mxu0 (!%p202_p10), %v724_v3  ;;  %v567_v4 = vpack.c.bf16 (!%p202_p10), %v247_v1, %v246_v0  ;;  %v249_v5 = vld [vmem:[%s917_s1 + $0x18] sm:$0xff] (!%p202_p10)  ;;  %544 = vmatprep.mubr.msk.f32.mxu0 (!%p202_p10), %vm725_vm0, %v726_v6  ;;  %p228_p11 = scmp.lt.s32.totalorder (!%p202_p10), %s714_s21, 1  ;;  %v514_v7 = vld [vmem:[%s920_s4] ss:$0 sm:$0xff] (!%p202_p10)  ;;  %vm243_vm1 = vcmask (!%p202_p10), 261120  }
  0x10   : > { %244 = vst.msk [vmem:[#allocation2] sm:$0xff] (!%p202_p10), %vm243_vm1, %v514_v7  ;;  %572 = vmatprep.subr.bf16.mxu1 (!%p202_p10), %v724_v3  ;;  %563 = vmatprep.mubr.msk.f32.mxu1 (!%p202_p10), %vm725_vm0, %v726_v6  ;;  %v570_v8 = vpack.c.bf16 (!%p202_p10), %v249_v5, %v248_v2  ;;  %v337_v10 = vld [vmem:[%s919_s3] sm:$0xff] (!%p202_p10)  ;;  %v338_v11 = vld [vmem:[%s919_s3 + $0x8] sm:$0xff] (!%p202_p10)  ;;  %v339_v13 = vld [vmem:[%s919_s3 + $0x10] sm:$0xff] (!%p202_p10)  ;;  %vm345_vm2 = vcmask (!%p202_p10), 523264   ;;  %s225_s10 = sand.u32 (!%p202_p10), 1, %s706_s19  }
  0x11   : > { %568 = vmatpush3.bf16.msra.mxu0 (!%p202_p10), %v567_v4  ;;  %v573_v12 = vpack.c.bf16 (!%p202_p10), %v338_v11, %v337_v10  ;;  %v340_v14 = vld [vmem:[%s919_s3 + $0x18] sm:$0xff] (!%p202_p10)  ;;  %v341_v16 = vld [vmem:[%s919_s3 + $0x20] sm:$0xff] (!%p202_p10)  ;;  %v342_v17 = vld [vmem:[%s919_s3 + $0x28] sm:$0xff] (!%p202_p10)  ;;  %s512_s11 = sshll.u32 (!%p202_p10), %s225_s10, 3  ;;  %s519_s12 = sshll.u32 (!%p202_p10), %s714_s21, 7 }
  0x12   : > { %569 = vmatprep.subr.bf16.mxu0 (!%p202_p10), %v724_v3  ;;  %v576_v15 = vpack.c.bf16 (!%p202_p10), %v340_v14, %v339_v13  ;;  %v579_v18 = vpack.c.bf16 (!%p202_p10), %v342_v17, %v341_v16  ;;  %v343_v19 = vld [vmem:[%s919_s3 + $0x30] sm:$0xff] (!%p202_p10)  ;;  %v344_v20 = vld [vmem:[%s919_s3 + $0x38] sm:$0xff] (!%p202_p10)  ;;  %v515_v22 = vld [vmem:[%s918_s2] ss:$0 sm:$0xff] (!%p202_p10)  ;;  %s227_s13 = scalar_lea.vmem (!%p202_p10), [#allocation3], %s512_s11 }
  0x13   : > { %574 = vmatpush3.bf16.msra.mxu1 (!%p202_p10), %v573_v12  ;;  %v582_v21 = vpack.c.bf16 (!%p202_p10), %v344_v20, %v343_v19  ;;  %s440_s14 = sshll.u32 (!%p202_p10), %s227_s13, 4  ;;  %s870_s14 = int_to_ptr.vmem [resolvable:$true] %s440_s14 }
  0x14   : > { %575 = vmatprep.subr.bf16.mxu1 (!%p202_p10), %v724_v3  ;;  %s644_s25 = scalar_lea.vmem (!%p202_p10), %s870_s14, 128 }
  0x15   : > { %571 = vmatpush3.bf16.msra.mxu0 (!%p202_p10), %v570_v8  ;;  %p645_p12 = scmp.ne.s32.totalorder (!%p202_p10), %s870_s14, %s644_s25 }
  0x16   : > { %s229_s17 = scalar_select %p228_p11, %s714_s21, 1 }
  0x17   : > { %577 = vmatpush3.bf16.msra.mxu1 %v576_v15  ;;  %v336_v31 = vld [vmem:[#allocation2] sm:$0xff]  ;;  %p646_p13 = pnand %p645_p12, %p798_p4  ;;  %s727_s21 = smov [#allocation3]  }
  0x18   : > { %s513_s24 = sshll.u32 %s229_s17, 3  ;;  %578 = vmatprep.subr.bf16.mxu1 %v724_v3  ;;  %s868_s17 = scalar_lea.hbm %s921_s5, %s519_s12 }
  0x19   : > { %s231_s29 = scalar_lea.vmem %s916_s0, %s513_s24  ;;  %s427_s24 = scalar_lea.sflag [#allocation4], %s225_s10 }
  0x1a   : > { %v245_v9 = vld [vmem:[%s231_s29] sm:$0xff]  ;;  %p647_p0 = pneg %p646_p13  ;;  %s648_s27 = sshll.u32 %s727_s21, 4  ;;  %s649_s27 = int_to_ptr.vmem [resolvable:$false] %s648_s27 }
  0x1b   : > { %545 = vmatmul.mubr.msk.f32.vlgmr.msra.gmra.mrb[0].mxu0 %vm243_vm1, %v245_v9  ;;  %580 = vmatpush3.bf16.msra.mxu1 %v579_v18  ;;  %s650_s29 = scalar_lea.vmem %s649_s27, 256  ;;  %p651_p1 = scmp.lt.s32.totalorder %s870_s14, %s649_s27 }
  0x1c   : > { %581 = vmatprep.subr.bf16.mxu1 %v724_v3  ;;  %p652_p2 = scmp.lt.s32.totalorder %s650_s29, %s644_s25 }
  0x1e   : > { %p653_p3 = por %p652_p2, %p651_p1 }
  0x1f   : > { %583 = vmatpush3.bf16.msra.mxu1 %v582_v21 }
  0x20   : > { %p654_p5 = pnand %p653_p3, %p647_p0 }
  0xee   : > { %v327_v23 = vpop.f32.mrb[0].mxu0 }
  0xef   : > { %v328_v24 = vadd.f32 %v515_v22, %v327_v23  ;;  %v546_v25 = vpop.f32.mrb[1].mxu0 }
  0xf1   : > { %v332_v26 = vmul.f32 0.70710677, %v328_v24  ;;  %v331_v28 = vmul.f32 0.5, %v328_v24 }
  0xf3   : > { %642 = verf.f32 %v332_v26 }
  0xfd   : > { %v643_v27 = vpop.eup %642 }
  0xfe   : > { %v334_v29 = vadd.f32 1.0, %v643_v27 }
 0x100   : > { %v335_v30 = vmul.f32 %v334_v29, %v331_v28 }
 0x102   : > { %564 = vmatmul.mubr.msk.f32.vlgmr.msra.gmra.mrb[0].mxu1 %vm345_vm2, %v335_v30 }
 0x1d5   : > { %v415_v32 = vpop.f32.mrb[0].mxu1 }
 0x1d6   : > { %v419_v33 = vadd.f32 %v415_v32, %v336_v31  ;;  %v565_v34 = vpop.f32.mrb[1].mxu1 }
 0x1d8   : > { %420 = vst.msk [vmem:[#allocation2] sm:$0xff] %vm243_vm1, %v419_v33 }
 0x1df   : > { %v424_v35 = vld [vmem:[#allocation2] sm:$0xff] }
 0x1e0   : > { %425 = vst.msk [vmem:[%s227_s13] sm:$0xff] %vm243_vm1, %v424_v35 }
 0x1e1   : > { %657 = shalt.err (!%p654_p5)
}
 0x1e2   : > { %s658_s7 = scalar_lea.hbm %s868_s17, 128  ;;  %s662_s10 = scalar_lea.hbm %s921_s5, 256 }
 0x1e3   : > { %p659_p6 = scmp.ne.s32.totalorder %s868_s17, %s658_s7  ;;  %p663_p10 = scmp.lt.u32.totalorder %s868_s17, %s921_s5 }
 0x1e4   : > { %p664_p11 = scmp.lt.u32.totalorder %s662_s10, %s658_s7  ;;  %p666_p13 = scmp.lt.u32.totalorder %s658_s7, %s868_s17 }
 0x1e5   : > { %p660_p7 = pnand %p659_p6, %p798_p4 }
 0x1e6   : > { %p665_p12 = por %p664_p11, %p663_p10 }
 0x1e7   : > { %p661_p9 = pneg %p660_p7 }
 0x1e8   : > { %p667_p0 = por %p666_p13, %p665_p12 }
 0x1ea   : > { %p668_p1 = pnand %p667_p0, %p661_p9 }
 0x1ec   : > { %671 = shalt.err (!%p668_p1)
}
 0x1ed   : > { %584 = dma.vmem_to_hbm [thread:$0]  (%p798_p4), %s870_s14, 128, %s868_s17, %s427_s24  }
 0x1ee PF: > { %p590_p2 = scmp.ge.s32.totalorder %s722_s23, 2  ;;  %s452_s13 = sand.u32 1, %s702_s18  }
 0x1ef   : > { %s453_s15 = scalar_lea.sflag [#allocation4], %s452_s13 }
 0x1f0   : > { %p587_p3 = pnand %p590_p2, %p805_p8 }
 0x1f2   : > { %697 = dma.done.wait (!%p587_p3), %s453_s15, 128  }
 0x1f3   : > { %699 = vsyncadd (!%p587_p3), %s453_s15, 4294967168  ;;  %s18_s23 = sadd.s32 1, %s722_s23   ;;  %s924_s18 = smov %s706_s19 }
 0x1f4   : > { %p15_p5 = scmp.ge.s32.totalorder %s18_s23, 4   ;;  %s925_s19 = smov %s710_s20 }
 0x1f5   : > { %s926_s20 = smov %s811_s6  ;;  %s927_s21 = smov %s718_s22 }
 0x1f6   : > { %s928_s22 = smov %s930_s26  ;;  %17 = sbr.rel (!%p15_p5) target bundleno = 4 (0x4), region = 83 }
 0x1fd   :  { %458 = vsyncpa [#allocation4], 1 }
 0x1fe   :  { %460 = vsyncpa [#allocation4 + $0x1], 1 }

</bundles_post_ra>
